<compile_context>
chip_gen: v7x
topology: tpu7x:2x2x1
jax: 0.10.0
libtpu: 0.0.40
codegen_flags: <defaults>
</compile_context>

<pallas_src>
import math

import jax
import jax.numpy as jnp
from jax import lax
from jax.experimental import pallas as pl
from jax.experimental.pallas import tpu as pltpu


# ---------------------------------------------------------------------------
# Kernel 1: fused QKV projection  (x in (C, S) layout, weights (3C, C))
# ---------------------------------------------------------------------------
def qkv_proj_kernel(x_ref, w_ref, b_ref, q_ref, k_ref, v_ref):
    C = q_ref.shape[1]
    x = x_ref[0].astype(w_ref.dtype)                            # (C, ts) bf16
    qkv = jnp.dot(w_ref[...], x, preferred_element_type=jnp.float32)
    qkv = qkv + b_ref[...]                                      # (3C, ts) f32
    # Q rows were pre-scaled by 1/sqrt(C) (folded into wq/bq in the wrapper).
    q_ref[0] = qkv[0:C, :].astype(q_ref.dtype)
    k_ref[0] = qkv[C:2 * C, :].astype(k_ref.dtype)
    v_ref[0] = qkv[2 * C:3 * C, :].astype(v_ref.dtype)


# ---------------------------------------------------------------------------
# Kernel 2: flash attention (online softmax) fused with the output 1x1 conv
# ---------------------------------------------------------------------------
def flash_attn_out_kernel(q_ref, k_ref, v_ref, wo_ref, bo_ref, o_ref,
                          m_s, l_s, acc_s):
    ki = pl.program_id(2)

    @pl.when(ki == 0)
    def _():
        m_s[...] = jnp.full(m_s.shape, -jnp.inf, dtype=m_s.dtype)
        l_s[...] = jnp.zeros(l_s.shape, dtype=l_s.dtype)
        acc_s[...] = jnp.zeros(acc_s.shape, dtype=acc_s.dtype)

    qt = q_ref[0]                                               # (C, tq) bf16
    kt = k_ref[0]                                               # (C, tk) bf16
    vt = v_ref[0]                                               # (C, tk) bf16

    # Transposed score tile (tk, tq): contract over C on both operands — the
    # MXU consumes K "transposed" without an explicit XLU relayout.
    s = lax.dot_general(kt, qt, (((0,), (0,)), ((), ())),
                        preferred_element_type=jnp.float32)

    m_prev = m_s[...]                                           # (1, tq)
    m_new = jnp.maximum(m_prev, jnp.max(s, axis=0, keepdims=True))
    alpha = jnp.exp(m_prev - m_new)                             # (1, tq)
    p = jnp.exp(s - m_new)                                      # (tk, tq)
    l_s[...] = alpha * l_s[...] + jnp.sum(p, axis=0, keepdims=True)
    acc_s[...] = alpha * acc_s[...] + jnp.dot(
        vt, p.astype(vt.dtype), preferred_element_type=jnp.float32)  # (C, tq)
    m_s[...] = m_new

    @pl.when(ki == pl.num_programs(2) - 1)
    def _():
        # Normalize once on (C, tq) instead of on the (tq, tk) score tiles.
        y = acc_s[...] * pl.reciprocal(l_s[...], approx=True)   # (C, tq)
        out = jnp.dot(wo_ref[...], y.astype(wo_ref.dtype),
                      preferred_element_type=jnp.float32) + bo_ref[...]
        o_ref[0] = out.astype(o_ref.dtype)


# ---------------------------------------------------------------------------
# Wrapper
# ---------------------------------------------------------------------------
def _pick_tile(S, preferred=(256, 128)):
    for t in preferred:
        if t <= S and S % t == 0:
            return t
    return S


def attention_block(x_nchw, params, *, ts=None, tq=None, tk=None):
    """x_nchw: (B, C, H, W) float32. params: dict of 1x1-conv weights/biases."""
    B, C, H, W = x_nchw.shape
    S = H * W
    cdtype = jnp.bfloat16

    ts = _pick_tile(S) if ts is None else ts
    tq = _pick_tile(S) if tq is None else tq
    tk = _pick_tile(S) if tk is None else tk
    assert S % ts == 0 and S % tq == 0 and S % tk == 0

    # NCHW -> (B, C, S): a pure reshape, no transpose / extra HBM pass.
    x_bcs = x_nchw.reshape(B, C, S)

    scale = 1.0 / math.sqrt(C)

    def w2d(w):  # Conv2d(k=1) weight (C_out, C_in, 1, 1) -> (C_out, C_in)
        return w.reshape(C, C)

    # Fused QKV weight (3C, C); fold the attention scale into the Q rows.
    w_qkv = jnp.concatenate(
        [w2d(params["wq"]) * scale, w2d(params["wk"]), w2d(params["wv"])],
        axis=0).astype(cdtype)                                    # (3C, C)
    b_qkv = jnp.concatenate(
        [params["bq"] * scale, params["bk"], params["bv"]],
        axis=0).reshape(3 * C, 1).astype(jnp.float32)             # (3C, 1)
    w_o = w2d(params["wo"]).astype(cdtype)                        # (C, C)
    b_o = params["bo"].reshape(C, 1).astype(jnp.float32)          # (C, 1)

    # ---- kernel 1: fused QKV projection ----
    q, k, v = pl.pallas_call(
        qkv_proj_kernel,
        out_shape=(jax.ShapeDtypeStruct((B, C, S), cdtype),) * 3,
        grid=(B, S // ts),
        in_specs=[pl.BlockSpec((1, C, ts), lambda b, si: (b, 0, si)),
                  pl.BlockSpec((3 * C, C), lambda b, si: (0, 0)),
                  pl.BlockSpec((3 * C, 1), lambda b, si: (0, 0))],
        out_specs=(pl.BlockSpec((1, C, ts), lambda b, si: (b, 0, si)),) * 3,
        compiler_params=pltpu.CompilerParams(
            dimension_semantics=("parallel", "parallel")),
    )(x_bcs, w_qkv, b_qkv)

    # ---- kernel 2: flash attention + output projection ----
    out_bcs = pl.pallas_call(
        flash_attn_out_kernel,
        out_shape=jax.ShapeDtypeStruct((B, C, S), x_nchw.dtype),
        grid=(B, S // tq, S // tk),
        in_specs=[pl.BlockSpec((1, C, tq), lambda b, qi, ki: (b, 0, qi)),
                  pl.BlockSpec((1, C, tk), lambda b, qi, ki: (b, 0, ki)),
                  pl.BlockSpec((1, C, tk), lambda b, qi, ki: (b, 0, ki)),
                  pl.BlockSpec((C, C), lambda b, qi, ki: (0, 0)),
                  pl.BlockSpec((C, 1), lambda b, qi, ki: (0, 0))],
        out_specs=pl.BlockSpec((1, C, tq), lambda b, qi, ki: (b, 0, qi)),
        scratch_shapes=[pltpu.VMEM((1, tq), jnp.float32),   # running max m
                        pltpu.VMEM((1, tq), jnp.float32),   # running sum l
                        pltpu.VMEM((C, tq), jnp.float32)],  # output accum
        compiler_params=pltpu.CompilerParams(
            dimension_semantics=("parallel", "parallel", "arbitrary")),
    )(q, k, v, w_o, b_o)

    return out_bcs.reshape(B, C, H, W)


# ---------------------------------------------------------------------------
# Pure-JAX reference matching the PyTorch forward
# ---------------------------------------------------------------------------
def reference(x_nchw, params):
    B, C, H, W = x_nchw.shape
    S = H * W

    def conv1x1(x, w, b):  # x: (B, C, S)
        return jnp.einsum("oc,bcs->bos", w.reshape(C, C), x) + b.reshape(1, C, 1)

    xf = x_nchw.reshape(B, C, S)
    q = jnp.transpose(conv1x1(xf, params["wq"], params["bq"]), (0, 2, 1))
    k = jnp.transpose(conv1x1(xf, params["wk"], params["bk"]), (0, 2, 1))
    v = jnp.transpose(conv1x1(xf, params["wv"], params["bv"]), (0, 2, 1))
    s = jnp.einsum("bqc,bkc->bqk", q, k) / math.sqrt(C)
    p = jax.nn.softmax(s, axis=-1)
    y = jnp.einsum("bqk,bkc->bqc", p, v)
    y = jnp.transpose(y, (0, 2, 1))  # (B, C, S)
    out = conv1x1(y, params["wo"], params["bo"])
    return out.reshape(B, C, H, W)


def init_params(key, C):
    keys = jax.random.split(key, 8)
    bound = 1.0 / math.sqrt(C)

    def u(k, shape):
        return jax.random.uniform(k, shape, jnp.float32, -bound, bound)

    return {
        "wq": u(keys[0], (C, C, 1, 1)), "bq": u(keys[1], (C,)),
        "wk": u(keys[2], (C, C, 1, 1)), "bk": u(keys[3], (C,)),
        "wv": u(keys[4], (C, C, 1, 1)), "bv": u(keys[5], (C,)),
        "wo": u(keys[6], (C, C, 1, 1)), "bo": u(keys[7], (C,)),
    }


if __name__ == "__main__":
    key = jax.random.PRNGKey(0)
    kx, kp = jax.random.split(key)

    B, C, H, W = 2, 4, 16, 16
    x = jax.random.normal(kx, (B, C, H, W), jnp.float32)
    params = init_params(kp, C)

    # tq=tk=128 so the toy S=256 exercises the multi-step online-softmax path.
    out = jax.block_until_ready(attention_block(x, params, tq=128, tk=128))
    ref = jax.block_until_ready(reference(x, params))

    assert out.shape == (B, C, H, W)
    max_err = float(jnp.max(jnp.abs(out - ref)))
    # bf16 operands with f32 accumulation -> relaxed tolerance vs f32 reference
    assert jnp.allclose(out, ref, atol=2e-2, rtol=2e-2), (
        f"mismatch vs reference, max abs err={max_err}")

    print("KERNEL_OK")
</pallas_src>

<mosaic_0001>
module attributes {stable_mosaic.version = 11 : i64} {
  func.func @qkv_proj_kernel(%arg0: i32, %arg1: i32, %arg2: memref<1x4x256xf32, #tpu.memory_space<vmem>>, %arg3: memref<12x4xbf16, #tpu.memory_space<vmem>>, %arg4: memref<12x1xf32, #tpu.memory_space<vmem>>, %arg5: memref<1x4x256xbf16, #tpu.memory_space<vmem>>, %arg6: memref<1x4x256xbf16, #tpu.memory_space<vmem>>, %arg7: memref<1x4x256xbf16, #tpu.memory_space<vmem>>) attributes {dimension_semantics = [#tpu.dimension_semantics<parallel>, #tpu.dimension_semantics<parallel>], iteration_bounds = array<i64: 2, 1>, scalar_prefetch = 0 : i64, scratch_operands = 0 : i64, tpu.core_type = #tpu.core_type<tc>, window_params = [{transform_indices = @transform_0, window_bounds = array<i64: 1, 4, 256>}, {pipeline_mode = #tpu.pipeline_mode<synchronous>, transform_indices = @transform_1, window_bounds = array<i64: 12, 4>}, {pipeline_mode = #tpu.pipeline_mode<synchronous>, transform_indices = @transform_2, window_bounds = array<i64: 12, 1>}, {transform_indices = @transform_3, window_bounds = array<i64: 1, 4, 256>}, {transform_indices = @transform_4, window_bounds = array<i64: 1, 4, 256>}, {transform_indices = @transform_5, window_bounds = array<i64: 1, 4, 256>}]} {
    %c0 = arith.constant 0 : index
    %c0_0 = arith.constant 0 : index
    %c0_1 = arith.constant 0 : index
    %0 = vector.load %arg2[%c0, %c0_0, %c0_1] : memref<1x4x256xf32, #tpu.memory_space<vmem>>, vector<1x4x256xf32>
    %1 = vector.shape_cast %0 : vector<1x4x256xf32> to vector<4x256xf32>
    %2 = arith.truncf %1 : vector<4x256xf32> to vector<4x256xbf16>
    %c0_2 = arith.constant 0 : index
    %c0_3 = arith.constant 0 : index
    %3 = vector.load %arg3[%c0_2, %c0_3] : memref<12x4xbf16, #tpu.memory_space<vmem>>, vector<12x4xbf16>
    %cst = arith.constant dense<0.000000e+00> : vector<12x256xf32>
    %4 = tpu.matmul %3, %2, %cst {dimension_numbers = #tpu.dot_dimension_numbers<[1], [0], [0], [1], [0, 0, 1, 1], [], []>} : vector<12x4xbf16>, vector<4x256xbf16>, vector<12x256xf32> -> vector<12x256xf32>
    %c0_4 = arith.constant 0 : index
    %c0_5 = arith.constant 0 : index
    %5 = vector.load %arg4[%c0_4, %c0_5] : memref<12x1xf32, #tpu.memory_space<vmem>>, vector<12x1xf32>
    %6 = vector.broadcast %5 : vector<12x1xf32> to vector<12x256xf32>
    %7 = arith.addf %4, %6 : vector<12x256xf32>
    %8 = vector.extract_strided_slice %7 {offsets = [0, 0], sizes = [4, 256], strides = [1, 1]} : vector<12x256xf32> to vector<4x256xf32>
    %9 = arith.truncf %8 : vector<4x256xf32> to vector<4x256xbf16>
    %c0_6 = arith.constant 0 : index
    %c0_7 = arith.constant 0 : index
    %c0_8 = arith.constant 0 : index
    %10 = vector.load %arg5[%c0_6, %c0_7, %c0_8] : memref<1x4x256xbf16, #tpu.memory_space<vmem>>, vector<1x4x256xbf16>
    %11 = vector.shape_cast %10 : vector<1x4x256xbf16> to vector<4x256xbf16>
    %12 = vector.shape_cast %9 : vector<4x256xbf16> to vector<1x4x256xbf16>
    tpu.vector_store %arg5[%c0_6, %c0_7, %c0_8], %12 {strides = array<i32>} : memref<1x4x256xbf16, #tpu.memory_space<vmem>>, vector<1x4x256xbf16>,
    %13 = vector.extract_strided_slice %7 {offsets = [4, 0], sizes = [4, 256], strides = [1, 1]} : vector<12x256xf32> to vector<4x256xf32>
    %14 = arith.truncf %13 : vector<4x256xf32> to vector<4x256xbf16>
    %c0_9 = arith.constant 0 : index
    %c0_10 = arith.constant 0 : index
    %c0_11 = arith.constant 0 : index
    %15 = vector.load %arg6[%c0_9, %c0_10, %c0_11] : memref<1x4x256xbf16, #tpu.memory_space<vmem>>, vector<1x4x256xbf16>
    %16 = vector.shape_cast %15 : vector<1x4x256xbf16> to vector<4x256xbf16>
    %17 = vector.shape_cast %14 : vector<4x256xbf16> to vector<1x4x256xbf16>
    tpu.vector_store %arg6[%c0_9, %c0_10, %c0_11], %17 {strides = array<i32>} : memref<1x4x256xbf16, #tpu.memory_space<vmem>>, vector<1x4x256xbf16>,
    %18 = vector.extract_strided_slice %7 {offsets = [8, 0], sizes = [4, 256], strides = [1, 1]} : vector<12x256xf32> to vector<4x256xf32>
    %19 = arith.truncf %18 : vector<4x256xf32> to vector<4x256xbf16>
    %c0_12 = arith.constant 0 : index
    %c0_13 = arith.constant 0 : index
    %c0_14 = arith.constant 0 : index
    %20 = vector.load %arg7[%c0_12, %c0_13, %c0_14] : memref<1x4x256xbf16, #tpu.memory_space<vmem>>, vector<1x4x256xbf16>
    %21 = vector.shape_cast %20 : vector<1x4x256xbf16> to vector<4x256xbf16>
    %22 = vector.shape_cast %19 : vector<4x256xbf16> to vector<1x4x256xbf16>
    tpu.vector_store %arg7[%c0_12, %c0_13, %c0_14], %22 {strides = array<i32>} : memref<1x4x256xbf16, #tpu.memory_space<vmem>>, vector<1x4x256xbf16>,
    return
  }
  func.func @transform_0(%arg0: i32, %arg1: i32) -> (i32, i32, i32) {
    %c0_i32 = arith.constant 0 : i32
    %c0_i32_0 = arith.constant 0 : i32
    return %arg0, %c0_i32, %arg1 : i32, i32, i32
  }
  func.func @transform_1(%arg0: i32, %arg1: i32) -> (i32, i32) {
    %c0_i32 = arith.constant 0 : i32
    %c0_i32_0 = arith.constant 0 : i32
    %c0_i32_1 = arith.constant 0 : i32
    return %c0_i32, %c0_i32_0 : i32, i32
  }
  func.func @transform_2(%arg0: i32, %arg1: i32) -> (i32, i32) {
    %c0_i32 = arith.constant 0 : i32
    %c0_i32_0 = arith.constant 0 : i32
    %c0_i32_1 = arith.constant 0 : i32
    return %c0_i32, %c0_i32_0 : i32, i32
  }
  func.func @transform_3(%arg0: i32, %arg1: i32) -> (i32, i32, i32) {
    %c0_i32 = arith.constant 0 : i32
    %c0_i32_0 = arith.constant 0 : i32
    return %arg0, %c0_i32, %arg1 : i32, i32, i32
  }
  func.func @transform_4(%arg0: i32, %arg1: i32) -> (i32, i32, i32) {
    %c0_i32 = arith.constant 0 : i32
    %c0_i32_0 = arith.constant 0 : i32
    return %arg0, %c0_i32, %arg1 : i32, i32, i32
  }
  func.func @transform_5(%arg0: i32, %arg1: i32) -> (i32, i32, i32) {
    %c0_i32 = arith.constant 0 : i32
    %c0_i32_0 = arith.constant 0 : i32
    return %arg0, %c0_i32, %arg1 : i32, i32, i32
  }
}

</mosaic_0001>

<bundles_post_ra>
// kernel: tpu_custom_call.1
= control target key start
LH: loop header
LB: loop body
LE: loop exit
PB: predicated region body
PF: predicated region fallthrough
CT: control target
= control target key end

     0   :  { %11 = vsyncpa [#allocation3], 0  ;;  %s1084_s0 = inlined_call_operand.vmem [shape: f32[2,4,256], index: 0, kind: input, shape index: {}]   ;;  %s1085_s1 = inlined_call_operand.vmem [shape: bf16[12,4], index: 1, kind: input, shape index: {}]   ;;  %s1086_s2 = inlined_call_operand.vmem [shape: f32[12,1], index: 2, kind: input, shape index: {}]   ;;  %s1087_s3 = inlined_call_operand.hbm [shape: bf16[2,4,256], index: 3, kind: output, shape index: {0}]   ;;  %s1088_s4 = inlined_call_operand.hbm [shape: bf16[2,4,256], index: 4, kind: output, shape index: {1}]   ;;  %s1089_s5 = inlined_call_operand.hbm [shape: bf16[2,4,256], index: 5, kind: output, shape index: {2}]  }
   0x1   :  { %13 = vsyncpa [#allocation3 + $0x1], 0 }
   0x2   :  { %14 = vsyncpa [#allocation5], 0 }
   0x3   :  { %16 = vsyncpa [#allocation5 + $0x1], 0  ;;  %s868_s18 = smov 0   ;;  %s870_s19 = smov 0  }
   0x4   :  { %s872_s20 = smov 0   ;;  %s874_s21 = smov 0  }
   0x5   :  { %s876_s22 = smov 0   ;;  %s878_s23 = smov 0  }
   0x6 LB: > { %s591_s24 = sadd.s32 4294967295, %s831_s23   ;;  %s1090_s25 = sadd.s32 4294967294, %s831_s23   ;;  %s831_s23 = sphi %s878_s23, %s22_s23   ;;  %s827_s22 = sphi %s876_s22, %s1102_s22   ;;  %s823_s21 = sphi %s874_s21, %s1101_s21   ;;  %s819_s20 = sphi %s872_s20, %s1100_s20   ;;  %s815_s19 = sphi %s870_s19, %s1099_s19   ;;  %s811_s18 = sphi %s868_s18, %s1098_s18  }
   0x7   : > { %s34_s26 = sadd.s32 1, %s827_s22  ;;  %s113_s27 = sadd.s32 1, %s819_s20 }
   0x8   : > { %p36_p0 = scmp.ge.s32.totalorder %s34_s26, 2  ;;  %p123_p1 = scmp.ne.s32.totalorder %s819_s20, %s815_s19 }
   0x9   : > { %p124_p2 = scmp.eq.s32.totalorder %s591_s24, 1  ;;  %p129_p3 = scmp.ne.s32.totalorder %s815_s19, %s811_s18 }
   0xa   : > { %s1104_s26 = smov (%p36_p0, %s34_s26), 0  ;;  %p130_p5 = scmp.eq.s32.totalorder %s1090_s25, 1 }
   0xb   : > { %p910_p4 = por %p124_p2, %p123_p1  ;;  %s108_s29 = ssub.s32 %s827_s22, %s1104_s26 }
   0xc   : > { %p595_p6 = scmp.ge.s32.totalorder %s831_s23, 1  ;;  %p111_p7 = scmp.eq.s32.totalorder %s108_s29, 0 }
   0xd   : > { %p919_p8 = por %p130_p5, %p129_p3  ;;  %p223_p9 = scmp.lt.s32.totalorder %s831_s23, 3 }
   0xe   : > { %s925_s6 = scalar_select %p111_p7, %s819_s20, %s113_s27  }
   0xf   : > { %p224_p10 = pnand %p595_p6, %p223_p9 }
  0x10   : > { %p266_p11 = scmp.lt.s32.totalorder (!%p224_p10), %s823_s21, 1  ;;  %v833_v0 = vmov (!%p224_p10), 0   ;;  %v287_v1 = vld [vmem:[%s1086_s2] sm:$0xff] (!%p224_p10)  ;;  %v288_v2 = vld [vmem:[%s1086_s2 + $0x8] sm:$0xf] (!%p224_p10)  ;;  %vm308_vm0 = vcmask (!%p224_p10), 1041408   ;;  %v366_v12 = vlaneseq (!%p224_p10) }
  0x11   : > { %227 = sbr.rel (%p224_p10) target bundleno = 315 (0x13b), region = 32  ;;  %347 = vmatprep.mubr.bf16.mxu0 (!%p224_p10), %v833_v0  ;;  %690 = vset.pattern.permute.xlu0 (!%p224_p10), %v833_v0  ;;  %v692_v8 = vld [vmem:[%s1085_s1] sm:$0x3f] (!%p224_p10)   ;;  %vm304_vm1 = vcmask (!%p224_p10), 31744   ;;  %v834_v10 = vmov (!%p224_p10), 1983009808  }
  0x12   : > { %291 = vperm.xlu0 (!%p224_p10), %690, %v287_v1   ;;  %v364_v11 = vunpack.c.l.s4 (!%p224_p10), %v834_v10  ;;  %s248_s27 = sand.u32 (!%p224_p10), 1, %s815_s19   ;;  %v367_v14 = vshrl.u32 (!%p224_p10), %v366_v12, 7  ;;  %s945_s7 = sshll.u32 (!%p224_p10), %s823_s21, 6 }
  0x13   : > { %s942_s29 = sshll.u32 (!%p224_p10), %s248_s27, 2  ;;  %s950_s10 = sand.u32 (!%p224_p10), 1, %s591_s24  }
  0x14   : > { %v365_v13 = vunpack.c.0.s8 (!%p224_p10), %v364_v11  ;;  %s250_s8 = scalar_lea.vmem (!%p224_p10), [#allocation2], %s942_s29  ;;  %s1091_s13 = scalar_lea.vmem (!%p224_p10), [#allocation4], %s942_s29 }
  0x15   : > { %s963_s14 = sshll.u32 (!%p224_p10), %s1091_s13, 4  ;;  %s1092_s24 = scalar_lea.vmem (!%p224_p10), [#allocation6], %s942_s29  ;;  %s1000_s14 = int_to_ptr.vmem [resolvable:$true] %s963_s14 }
  0x16   : > { %296 = vperm.xlu0 (!%p224_p10), %690, %v288_v2   ;;  %v368_v20 = vsub.s32 (!%p224_p10), %v365_v13, %v367_v14  ;;  %s390_s16 = scalar_lea.sflag (!%p224_p10), [#allocation3], %s248_s27  ;;  %s835_s11 = smov (!%p224_p10), [#allocation2]  }
  0x18   : > { %s267_s9 = scalar_select %p266_p11, %s823_s21, 1 }
  0x19   : > { %s956_s21 = scalar_lea.hbm %s1087_s3, %s945_s7 }
  0x1a   : > { %s619_s12 = sshll.u32 %s267_s9, 3  ;;  %s416_s9 = sshll.u32 %s250_s8, 4  ;;  %s958_s9 = int_to_ptr.vmem [resolvable:$true] %s416_s9 }
  0x1b   : > { %s273_s15 = scalar_lea.vmem %s1084_s0, %s619_s12  ;;  %s693_s17 = scalar_lea.vmem %s958_s9, 64 }
  0x1c   : > { %v279_v3 = vld [vmem:[%s273_s15] sm:$0xff]  ;;  %s968_s15 = sshll.u32 %s1092_s24, 4  ;;  %p694_p12 = scmp.ne.s32.totalorder %s958_s9, %s693_s17  ;;  %s1009_s15 = int_to_ptr.vmem [resolvable:$true] %s968_s15 }
  0x1d   : > { %v281_v4 = vcombine.high %v279_v3, %v279_v3  ;;  %v283_v5 = vpack.c.bf16 %v279_v3, %v279_v3  ;;  %s697_s12 = sshll.u32 %s835_s11, 4  ;;  %s698_s12 = int_to_ptr.vmem [resolvable:$false] %s697_s12 }
  0x1e   : > { %p695_p13 = pnand %p694_p12, %p910_p4  ;;  %s699_s25 = scalar_lea.vmem %s698_s12, 128 }
  0x1f   : > { %v284_v6 = vpack.c.bf16 %v281_v4, %v281_v4  ;;  %v310_v7 = vsel %vm308_vm0, %v283_v5, 0  ;;  %p700_p1 = scmp.lt.s32.totalorder %s958_s9, %s698_s12  ;;  %p701_p2 = scmp.lt.s32.totalorder %s699_s25, %s693_s17 }
  0x20   : > { %p696_p0 = pneg %p695_p13 }
  0x21   : > { %602 = vmatprep.subr.msk.bf16.mxu0 %vm308_vm0, %v284_v6  ;;  %p702_p3 = por %p701_p2, %p700_p1 }
  0x22   : > { %316 = vmatpush1.bf16.msra.mxu0 %v310_v7 }
  0x23   : > { %p703_p5 = pnand %p702_p3, %p696_p0 }
  0x25   : > { %603 = vmatmul.mubr.msk.bf16.vlgmr.msra.gmra.mrb[0].mxu0 %vm304_vm1, %v692_v8 }
  0x91   : > { %v292_v9 = vpop.permute.xlu0 %291 }
  0x95   : > { %v297_v16 = vpop.permute.xlu0 %296 }
  0xf8   : > { %v349_v15 = vpop.f32.mrb[0].mxu0 }
  0xf9   : > { %v350_v17 = vadd.f32 %v349_v15, %v292_v9  ;;  %v351_v18 = vpop.f32.mrb[1].mxu0 }
  0xfa   : > { %v352_v19 = vadd.f32 %v351_v18, %v292_v9  ;;  %v353_v21 = vpop.f32.mrb[2].mxu0 }
  0xfb   : > { %v354_v22 = vadd.f32 %v353_v21, %v297_v16  ;;  %v355_v23 = vpop.f32.mrb[3].mxu0 }
  0xfc   : > { %v604_v24 = vpack.c.bf16 %v352_v19, %v350_v17  ;;  %v356_v25 = vadd.f32 %v355_v23, %v297_v16 }
  0xfe   : > { %v369_v26 = vrot.slane %v604_v24, %v368_v20  ;;  %v606_v27 = vpack.c.bf16 %v356_v25, %v354_v22  ;;  %605 = vst.sshfl [vmem:[%s250_s8] sm:$0x33 pattern:$0x76325410] %v604_v24 }
  0xff   : > { %706 = shalt.err (!%p703_p5)
}
 0x100   : > { %s707_s27 = scalar_lea.hbm %s956_s21, 64  ;;  %s711_s11 = scalar_lea.hbm %s1087_s3, 128 }
 0x101   : > { %p708_p6 = scmp.ne.s32.totalorder %s956_s21, %s707_s27  ;;  %p712_p10 = scmp.lt.u32.totalorder %s956_s21, %s1087_s3 }
 0x102   : > { %p713_p11 = scmp.lt.u32.totalorder %s711_s11, %s707_s27  ;;  %p715_p13 = scmp.lt.u32.totalorder %s707_s27, %s956_s21 }
 0x103   : > { %p709_p7 = pnand %p708_p6, %p910_p4 }
 0x104   : > { %p714_p12 = por %p713_p11, %p712_p10 }
 0x105   : > { %p710_p9 = pneg %p709_p7 }
 0x106   : > { %p716_p0 = por %p715_p13, %p714_p12 }
 0x108   : > { %p717_p1 = pnand %p716_p0, %p710_p9 }
 0x10a   : > { %720 = shalt.err (!%p717_p1)
}
 0x10b   : > { %623 = dma.vmem_to_hbm [thread:$0]  (%p910_p4), %s958_s9, 64, %s956_s21, %s390_s16   ;;  %v372_v28 = vcombine.high %v369_v26, %v369_v26 }
 0x10c   : > { %s1095_s25 = scalar_lea.vmem [#allocation6], %s942_s29  ;;  %s997_s17 = scalar_lea.hbm %s1088_s4, %s945_s7 }
 0x10d   : > { %607 = vst.sshfl [vmem:[%s1095_s25] sm:$0x33 pattern:$0x76325410] %v606_v27  ;;  %s1006_s11 = scalar_lea.hbm %s1089_s5, %s945_s7  ;;  %s1096_s9 = scalar_lea.vmem [#allocation4], %s942_s29 }
 0x10e   : > { %374 = vst [vmem:[%s1096_s9] sm:$0xf] %v372_v28  ;;  %s395_s21 = scalar_lea.sflag [#allocation5], %s950_s10  ;;  %s721_s16 = scalar_lea.vmem %s1000_s14, 64 }
 0x10f   : > { %p722_p2 = scmp.ne.s32.totalorder %s1000_s14, %s721_s16  ;;  %s836_s12 = smov [#allocation4]  }
 0x110   : > { %s725_s25 = sshll.u32 %s836_s12, 4  ;;  %s726_s25 = int_to_ptr.vmem [resolvable:$false] %s725_s25 }
 0x111   : > { %p723_p3 = pnand %p722_p2, %p910_p4  ;;  %s727_s13 = scalar_lea.vmem %s726_s25, 128 }
 0x112   : > { %p728_p6 = scmp.lt.s32.totalorder %s1000_s14, %s726_s25  ;;  %p729_p7 = scmp.lt.s32.totalorder %s727_s13, %s721_s16 }
 0x113   : > { %p724_p5 = pneg %p723_p3 }
 0x114   : > { %p730_p9 = por %p729_p7, %p728_p6 }
 0x116   : > { %p731_p10 = pnand %p730_p9, %p724_p5 }
 0x118   : > { %734 = shalt.err (!%p731_p10)
}
 0x119   : > { %s735_s29 = scalar_lea.hbm %s997_s17, 64  ;;  %s739_s27 = scalar_lea.hbm %s1088_s4, 128 }
 0x11a   : > { %p736_p11 = scmp.ne.s32.totalorder %s997_s17, %s735_s29  ;;  %p740_p0 = scmp.lt.u32.totalorder %s997_s17, %s1088_s4 }
 0x11b   : > { %p741_p1 = scmp.lt.u32.totalorder %s739_s27, %s735_s29  ;;  %p743_p3 = scmp.lt.u32.totalorder %s735_s29, %s997_s17 }
 0x11c   : > { %p737_p12 = pnand %p736_p11, %p910_p4 }
 0x11d   : > { %p742_p2 = por %p741_p1, %p740_p0 }
 0x11e   : > { %p738_p13 = pneg %p737_p12 }
 0x11f   : > { %p744_p5 = por %p743_p3, %p742_p2 }
 0x121   : > { %p745_p6 = pnand %p744_p5, %p738_p13 }
 0x123   : > { %748 = shalt.err (!%p745_p6)
}
 0x124   : > { %624 = dma.vmem_to_hbm [thread:$0]  (%p910_p4), %s1000_s14, 64, %s997_s17, %s395_s21  }
 0x125   : > { %s749_s16 = scalar_lea.vmem %s1009_s15, 64  ;;  %s837_s12 = smov [#allocation6]  }
 0x126   : > { %p750_p7 = scmp.ne.s32.totalorder %s1009_s15, %s749_s16  ;;  %s753_s25 = sshll.u32 %s837_s12, 4  ;;  %s754_s25 = int_to_ptr.vmem [resolvable:$false] %s753_s25 }
 0x127   : > { %s755_s13 = scalar_lea.vmem %s754_s25, 128  ;;  %p756_p11 = scmp.lt.s32.totalorder %s1009_s15, %s754_s25 }
 0x128   : > { %p751_p9 = pnand %p750_p7, %p910_p4  ;;  %p757_p12 = scmp.lt.s32.totalorder %s755_s13, %s749_s16 }
 0x12a   : > { %p752_p10 = pneg %p751_p9  ;;  %p758_p13 = por %p757_p12, %p756_p11 }
 0x12c   : > { %p759_p0 = pnand %p758_p13, %p752_p10 }
 0x12e   : > { %762 = shalt.err (!%p759_p0)
}
 0x12f   : > { %s763_s14 = scalar_lea.hbm %s1006_s11, 64  ;;  %s767_s7 = scalar_lea.hbm %s1089_s5, 128 }
 0x130   : > { %p764_p1 = scmp.ne.s32.totalorder %s1006_s11, %s763_s14  ;;  %p768_p5 = scmp.lt.u32.totalorder %s1006_s11, %s1089_s5 }
 0x131   : > { %p769_p6 = scmp.lt.u32.totalorder %s767_s7, %s763_s14  ;;  %p771_p9 = scmp.lt.u32.totalorder %s763_s14, %s1006_s11 }
 0x132   : > { %p765_p2 = pnand %p764_p1, %p910_p4 }
 0x133   : > { %p770_p7 = por %p769_p6, %p768_p5 }
 0x134   : > { %p766_p3 = pneg %p765_p2 }
 0x135   : > { %p772_p10 = por %p771_p9, %p770_p7 }
 0x137   : > { %p773_p11 = pnand %p772_p10, %p766_p3 }
 0x139   : > { %776 = shalt.err (!%p773_p11)
}
 0x13a   : > { %625 = dma.vmem_to_hbm [thread:$0]  (%p910_p4), %s1009_s15, 64, %s1006_s11, %s395_s21  }
 0x13b PF: > { %p639_p12 = scmp.ge.s32.totalorder %s831_s23, 2  ;;  %s460_s8 = sand.u32 1, %s811_s18  }
 0x13c   : > { %s461_s9 = scalar_lea.sflag [#allocation3], %s460_s8 }
 0x13d   : > { %p630_p13 = pnand %p639_p12, %p919_p8 }
 0x13f   : > { %802 = dma.done.wait (!%p630_p13), %s461_s9, 64  }
 0x140   : > { %804 = vsyncadd (!%p630_p13), %s461_s9, 4294967232  ;;  %s1097_s16 = sadd.s32 4294967294, %s831_s23  }
 0x141   : > { %s469_s12 = sand.u32 1, %s1097_s16  }
 0x142   : > { %s470_s28 = scalar_lea.sflag [#allocation5], %s469_s12 }
 0x143   : > { %806 = dma.done.wait (!%p630_p13), %s470_s28, 128  }
 0x144   : > { %808 = vsyncadd (!%p630_p13), %s470_s28, 4294967168  ;;  %s22_s23 = sadd.s32 1, %s831_s23   ;;  %s1098_s18 = smov %s815_s19 }
 0x145   : > { %p19_p4 = scmp.ge.s32.totalorder %s22_s23, 4   ;;  %s1099_s19 = smov %s819_s20 }
 0x146   : > { %s1100_s20 = smov %s925_s6  ;;  %s1101_s21 = smov %s827_s22 }
 0x147   : > { %s1102_s22 = smov %s1104_s26  ;;  %21 = sbr.rel (!%p19_p4) target bundleno = 6 (0x6), region = 99 }
 0x14e   :  { %484 = vsyncpa [#allocation3], 1 }
 0x14f   :  { %486 = vsyncpa [#allocation3 + $0x1], 1 }
 0x150   :  { %487 = vsyncpa [#allocation5], 1 }
 0x151   :  { %489 = vsyncpa [#allocation5 + $0x1], 1 }

</bundles_post_ra>
